<compile_context>
chip_gen: v6e
topology: v6e:2x2x1
jax: 0.10.0
libtpu: 0.0.40
codegen_flags: <defaults>
</compile_context>

<pallas_src>
import jax
import jax.numpy as jnp
from jax import lax
from jax.experimental import pallas as pl
from jax.experimental.pallas import tpu as pltpu


def _dep_classifier_kernel(x_ref, w12_ref, b12_ref, ub_ref, logits_ref, labels_ref):
    Bt, L, D = x_ref.shape
    Hp = w12_ref.shape[1] // 2
    V = ub_ref.shape[1] // Hp
    cdt = w12_ref.dtype            # matmul operand dtype: f32, or bf16 on v6e/v7x

    # ---- Fused MLP heads: ONE matmul over the whole (Bt*L, D) block -----------------------
    x = x_ref[...].reshape(Bt * L, D).astype(cdt)
    h12 = jnp.maximum(
        jnp.dot(x, w12_ref[...], preferred_element_type=jnp.float32) + b12_ref[...], 0.0)
    h1 = h12[:, :Hp]               # lane-aligned static slices (Hp is a multiple of 128)
    h2 = h12[:, Hp:]

    # ---- Fused bilinear, stage 1: single MXU matmul with lane-dense N = V*Hp ---------------
    # t[b*L+i, o*Hp+q] = sum_p h1[b*L+i, p] * U[p, q, o]   (bias folded into the const slot)
    t = jnp.dot(h1.astype(cdt), ub_ref[...], preferred_element_type=jnp.float32)
    # Row-major identification (pure index arithmetic, no transpose): rows ordered (b, i, o).
    t3 = t.reshape(Bt, L * V, Hp)
    h23 = h2.reshape(Bt, L, Hp)

    # ---- Fused bilinear, stage 2: ONE batched dot_general contracting Hp -------------------
    # s[b, i*V+o, j] = sum_q t3[b, i*V+o, q] * h2[b, j, q]
    s = lax.dot_general(t3.astype(cdt), h23.astype(cdt),
                        dimension_numbers=(((2,), (2,)), ((0,), (0,))),
                        preferred_element_type=jnp.float32)          # (Bt, L*V, L)

    # Direct lane-dense store of the whole slab (pair index j on the lane axis).
    logits_ref[...] = s

    # ---- Argmax over the label axis (first-max tie rule, same as torch/jnp argmax) ---------
    s4 = s.reshape(Bt, L, V, L)
    m = jnp.max(s4, axis=2, keepdims=True)                            # sublane reduce
    io = lax.broadcasted_iota(jnp.int32, s4.shape, 2)
    idx = jnp.min(jnp.where(s4 == m, io, V), axis=2)                  # (Bt, L, L), int32
    labels_ref[...] = idx


def dependency_classifier_forward(embeddings, true_seq_lengths, packed_params, *,
                                  batch_block=1):
    """Mirrors DependencyClassifier.forward: returns (logits (B, L*L, V), labels (B, L*L))."""
    B, L, D = embeddings.shape
    assert true_seq_lengths.shape[0] == B     # accepted but unused, as in the torch forward
    w12, b12, ub2d = packed_params
    Hp = w12.shape[1] // 2
    V = ub2d.shape[1] // Hp
    assert B % batch_block == 0
    Bt = batch_block

    x = embeddings.astype(w12.dtype)          # bf16 cast (if enabled) halves the x DMA bytes

    logits_raw, labels3 = pl.pallas_call(
        _dep_classifier_kernel,
        out_shape=(jax.ShapeDtypeStruct((B, L * V, L), jnp.float32),
                   jax.ShapeDtypeStruct((B, L, L), jnp.int32)),
        grid_spec=pltpu.PrefetchScalarGridSpec(
            num_scalar_prefetch=0,
            grid=(B // Bt,),
            in_specs=[
                pl.BlockSpec((Bt, L, D), lambda b: (b, 0, 0)),        # embeddings block
                pl.BlockSpec((D, 2 * Hp), lambda b: (0, 0)),          # [W1 | W2] (aug, padded)
                pl.BlockSpec((1, 2 * Hp), lambda b: (0, 0)),          # [b1 | b2] (aug, f32)
                pl.BlockSpec((Hp, V * Hp), lambda b: (0, 0)),         # fused bilinear (Hp, V*Hp)
            ],
            out_specs=[
                pl.BlockSpec((Bt, L * V, L), lambda b: (b, 0, 0)),
                pl.BlockSpec((Bt, L, L), lambda b: (b, 0, 0)),
            ],
        ),
        compiler_params=pltpu.CompilerParams(
            dimension_semantics=("parallel",),       # batch axis -> v7x's 2 TCs split it
            vmem_limit_bytes=32 * 1024 * 1024,
        ),
    )(x, w12, b12, ub2d)

    # Cheap XLA-side layout work: (B, L*V, L) -> (B, L, V, L) -> (B, L, L, V) -> flatten pairs.
    logits = jnp.transpose(logits_raw.reshape(B, L, V, L), (0, 1, 3, 2)).reshape(B, L * L, V)
    labels = labels3.reshape(B, L * L)
    return logits, labels


def init_params(key, D, H, V):
    """Deterministic synthetic parameters (shapes from the module __init__).
    NOTE: the real module zero-initialises the bilinear weight/bias (stanza init); random
    params are used here so the kernel output is non-trivial."""
    ks = jax.random.split(key, 6)
    W1 = jax.random.normal(ks[0], (H, D), jnp.float32) * 0.1     # nn.Linear(D, H).weight
    b1 = jax.random.normal(ks[1], (H,), jnp.float32) * 0.1
    W2 = jax.random.normal(ks[2], (H, D), jnp.float32) * 0.1
    b2 = jax.random.normal(ks[3], (H,), jnp.float32) * 0.1
    U = jax.random.normal(ks[4], (H + 1, H + 1, V), jnp.float32) * 0.1   # PairwiseBilinear.weight
    bias = jax.random.normal(ks[5], (V,), jnp.float32) * 0.1             # PairwiseBilinear.bias
    return W1, b1, W2, b2, U, bias


def pack_params(W1, b1, W2, b2, U, bias, *, dtype=jnp.float32, lane=128):
    """Glue: transpose linears, fold the '+1' ones-column and the bilinear bias, zero-pad the
    augmented hidden dim Hp=H+1 up to a multiple of 128 (exact), concatenate the two MLP heads
    into one (D, 2*Hp) weight, and pre-fuse the bilinear tensor to (Hp, V*Hp) with layout
    [p, o*Hp + q].  `dtype` selects the matmul operand dtype (bf16 on v6e/v7x); biases stay f32."""
    H, D = W1.shape
    V = bias.shape[0]
    Hp = ((H + 1 + lane - 1) // lane) * lane

    w1a = jnp.zeros((D, Hp), jnp.float32).at[:, :H].set(W1.T)
    b1a = jnp.zeros((1, Hp), jnp.float32).at[0, :H].set(b1).at[0, H].set(1.0)
    w2a = jnp.zeros((D, Hp), jnp.float32).at[:, :H].set(W2.T)
    b2a = jnp.zeros((1, Hp), jnp.float32).at[0, :H].set(b2).at[0, H].set(1.0)
    w12 = jnp.concatenate([w1a, w2a], axis=1)                    # (D, 2*Hp)
    b12 = jnp.concatenate([b1a, b2a], axis=1)                    # (1, 2*Hp)

    Upad = jnp.zeros((Hp, Hp, V), jnp.float32).at[:H + 1, :H + 1, :].set(U)
    Upad = Upad.at[H, H, :].add(bias)                            # bias -> (ones, ones) const slot
    ub2d = jnp.transpose(Upad, (0, 2, 1)).reshape(Hp, V * Hp)    # [p, o*Hp + q] = U[p, q, o]

    return (w12.astype(dtype), b12, ub2d.astype(dtype))


def reference_forward(x, W1, b1, W2, b2, U, bias):
    """Pure-JAX f32 reference of the torch semantics."""
    B, L, _ = x.shape
    h1 = jax.nn.relu(x @ W1.T + b1)
    h2 = jax.nn.relu(x @ W2.T + b2)
    ones = jnp.ones(h1.shape[:-1] + (1,), h1.dtype)
    h1a = jnp.concatenate([h1, ones], axis=-1)
    h2a = jnp.concatenate([h2, ones], axis=-1)
    logits = jnp.einsum('bip,pqo,bjq->bijo', h1a, U, h2a) + bias
    labels = jnp.argmax(logits, axis=-1)
    return logits.reshape(B, L * L, -1), labels.reshape(B, L * L)


if __name__ == "__main__":
    B, L, D, H, V = 2, 8, 32, 32, 8   # batch, max_seq_len, input_dim, hidden_size, len(vocab)

    key = jax.random.PRNGKey(0)
    k_x, k_p = jax.random.split(key)
    embeddings = jax.random.normal(k_x, (B, L, D), jnp.float32)
    true_seq_lengths = jnp.array([L, L - 3], dtype=jnp.int32)

    raw_params = init_params(k_p, D, H, V)
    ref_logits, ref_labels = reference_forward(embeddings, *raw_params)

    # ---- f32 operands, one batch per grid step (v7x: 2 parallel steps) — strict check ------
    packed_f32 = pack_params(*raw_params, dtype=jnp.float32)
    logits, labels = dependency_classifier_forward(embeddings, true_seq_lengths, packed_f32,
                                                   batch_block=1)
    logits, labels = jax.block_until_ready((logits, labels))
    assert logits.shape == (B, L * L, V)
    assert labels.shape == (B, L * L)
    assert jnp.allclose(logits, ref_logits, atol=2e-3, rtol=2e-3), "f32 logits mismatch"
    assert jnp.array_equal(labels, ref_labels.astype(jnp.int32)), "f32 labels mismatch"

    # ---- f32 operands, whole batch folded into one grid step (v5e/v6e step-overhead) -------
    logits_f, labels_f = dependency_classifier_forward(embeddings, true_seq_lengths,
                                                       packed_f32, batch_block=B)
    logits_f, labels_f = jax.block_until_ready((logits_f, labels_f))
    assert jnp.allclose(logits_f, ref_logits, atol=2e-3, rtol=2e-3), "folded logits mismatch"
    assert jnp.array_equal(labels_f, ref_labels.astype(jnp.int32)), "folded labels mismatch"

    # ---- bf16 operands (v6e/v7x MXU fast path, f32 accumulation) — re-validated tolerance --
    packed_bf16 = pack_params(*raw_params, dtype=jnp.bfloat16)
    logits_bf, labels_bf = dependency_classifier_forward(embeddings, true_seq_lengths,
                                                         packed_bf16, batch_block=1)
    logits_bf, labels_bf = jax.block_until_ready((logits_bf, labels_bf))
    assert jnp.allclose(logits_bf, ref_logits, atol=5e-2, rtol=5e-2), "bf16 logits mismatch"
    # Labels must be exactly the argmax of the logits the kernel itself emitted.
    assert jnp.array_equal(labels_bf, jnp.argmax(logits_bf, axis=-1).astype(jnp.int32)), \
        "bf16 labels not consistent with emitted logits"

    print("KERNEL_OK")
</pallas_src>

<mosaic_0001>
module attributes {stable_mosaic.version = 11 : i64} {
  func.func @_dep_classifier_kernel(%arg0: i32, %arg1: memref<1x8x32xf32, #tpu.memory_space<vmem>>, %arg2: memref<32x256xf32, #tpu.memory_space<vmem>>, %arg3: memref<1x256xf32, #tpu.memory_space<vmem>>, %arg4: memref<128x1024xf32, #tpu.memory_space<vmem>>, %arg5: memref<1x64x8xf32, #tpu.memory_space<vmem>>, %arg6: memref<1x8x8xi32, #tpu.memory_space<vmem>>) attributes {dimension_semantics = [#tpu.dimension_semantics<parallel>], iteration_bounds = array<i64: 2>, scalar_prefetch = 0 : i64, scratch_operands = 0 : i64, tpu.core_type = #tpu.core_type<tc>, window_params = [{transform_indices = @transform_0, window_bounds = array<i64: 1, 8, 32>}, {pipeline_mode = #tpu.pipeline_mode<synchronous>, transform_indices = @transform_1, window_bounds = array<i64: 32, 256>}, {pipeline_mode = #tpu.pipeline_mode<synchronous>, transform_indices = @transform_2, window_bounds = array<i64: 1, 256>}, {pipeline_mode = #tpu.pipeline_mode<synchronous>, transform_indices = @transform_3, window_bounds = array<i64: 128, 1024>}, {transform_indices = @transform_4, window_bounds = array<i64: 1, 64, 8>}, {transform_indices = @transform_5, window_bounds = array<i64: 1, 8, 8>}]} {
    %c0 = arith.constant 0 : index
    %c0_0 = arith.constant 0 : index
    %c0_1 = arith.constant 0 : index
    %0 = vector.load %arg1[%c0, %c0_0, %c0_1] : memref<1x8x32xf32, #tpu.memory_space<vmem>>, vector<1x8x32xf32>
    %1 = vector.shape_cast %0 : vector<1x8x32xf32> to vector<8x32xf32>
    %c0_2 = arith.constant 0 : index
    %c0_3 = arith.constant 0 : index
    %2 = vector.load %arg2[%c0_2, %c0_3] : memref<32x256xf32, #tpu.memory_space<vmem>>, vector<32x256xf32>
    %cst = arith.constant dense<0.000000e+00> : vector<8x256xf32>
    %3 = tpu.matmul %1, %2, %cst {dimension_numbers = #tpu.dot_dimension_numbers<[1], [0], [0], [1], [0, 0, 1, 1], [], []>} : vector<8x32xf32>, vector<32x256xf32>, vector<8x256xf32> -> vector<8x256xf32>
    %c0_4 = arith.constant 0 : index
    %c0_5 = arith.constant 0 : index
    %4 = vector.load %arg3[%c0_4, %c0_5] : memref<1x256xf32, #tpu.memory_space<vmem>>, vector<1x256xf32>
    %5 = vector.broadcast %4 : vector<1x256xf32> to vector<8x256xf32>
    %6 = arith.addf %3, %5 : vector<8x256xf32>
    %cst_6 = arith.constant 0.000000e+00 : f32
    %7 = vector.broadcast %cst_6 : f32 to vector<8x256xf32>
    %8 = arith.maximumf %6, %7 : vector<8x256xf32>
    %9 = vector.extract_strided_slice %8 {offsets = [0, 0], sizes = [8, 128], strides = [1, 1]} : vector<8x256xf32> to vector<8x128xf32>
    %10 = vector.extract_strided_slice %8 {offsets = [0, 128], sizes = [8, 128], strides = [1, 1]} : vector<8x256xf32> to vector<8x128xf32>
    %c0_7 = arith.constant 0 : index
    %c0_8 = arith.constant 0 : index
    %11 = vector.load %arg4[%c0_7, %c0_8] : memref<128x1024xf32, #tpu.memory_space<vmem>>, vector<128x1024xf32>
    %cst_9 = arith.constant dense<0.000000e+00> : vector<8x1024xf32>
    %12 = tpu.matmul %9, %11, %cst_9 {dimension_numbers = #tpu.dot_dimension_numbers<[1], [0], [0], [1], [0, 0, 1, 1], [], []>} : vector<8x128xf32>, vector<128x1024xf32>, vector<8x1024xf32> -> vector<8x1024xf32>
    %13 = vector.shape_cast %12 : vector<8x1024xf32> to vector<1x64x128xf32>
    %14 = vector.shape_cast %10 : vector<8x128xf32> to vector<1x8x128xf32>
    %cst_10 = arith.constant dense<0.000000e+00> : vector<1x64x8xf32>
    %15 = tpu.matmul %13, %14, %cst_10 {dimension_numbers = #tpu.dot_dimension_numbers<[2], [2], [1], [1], [0, 0, 0, 1, 1, 1], [0], [0]>} : vector<1x64x128xf32>, vector<1x8x128xf32>, vector<1x64x8xf32> -> vector<1x64x8xf32>
    %c0_11 = arith.constant 0 : index
    %c0_12 = arith.constant 0 : index
    %c0_13 = arith.constant 0 : index
    %16 = vector.load %arg5[%c0_11, %c0_12, %c0_13] : memref<1x64x8xf32, #tpu.memory_space<vmem>>, vector<1x64x8xf32>
    tpu.vector_store %arg5[%c0_11, %c0_12, %c0_13], %15 {strides = array<i32>} : memref<1x64x8xf32, #tpu.memory_space<vmem>>, vector<1x64x8xf32>,
    %17 = vector.shape_cast %15 : vector<1x64x8xf32> to vector<1x8x8x8xf32>
    %cst_14 = arith.constant dense<0xFF800000> : vector<1x8x8xf32>
    %18 = vector.multi_reduction <maximumf>, %17, %cst_14 [2] : vector<1x8x8x8xf32> to vector<1x8x8xf32>
    %19 = vector.shape_cast %18 : vector<1x8x8xf32> to vector<1x8x1x8xf32>
    %20 = tpu.iota {dimensions = array<i32: 2>} : vector<1x8x8x8xi32>
    %21 = vector.broadcast %19 : vector<1x8x1x8xf32> to vector<1x8x8x8xf32>
    %22 = arith.cmpf oeq, %17, %21 : vector<1x8x8x8xf32>
    %c8_i32 = arith.constant 8 : i32
    %23 = vector.broadcast %c8_i32 : i32 to vector<1x8x8x8xi32>
    %24 = arith.select %22, %20, %23 : vector<1x8x8x8xi1>, vector<1x8x8x8xi32>
    %cst_15 = arith.constant dense<2147483647> : vector<1x8x8xi32>
    %25 = vector.multi_reduction <minsi>, %24, %cst_15 [2] : vector<1x8x8x8xi32> to vector<1x8x8xi32>
    %c0_16 = arith.constant 0 : index
    %c0_17 = arith.constant 0 : index
    %c0_18 = arith.constant 0 : index
    %26 = vector.load %arg6[%c0_16, %c0_17, %c0_18] : memref<1x8x8xi32, #tpu.memory_space<vmem>>, vector<1x8x8xi32>
    tpu.vector_store %arg6[%c0_16, %c0_17, %c0_18], %25 {strides = array<i32>} : memref<1x8x8xi32, #tpu.memory_space<vmem>>, vector<1x8x8xi32>,
    return
  }
  func.func @transform_0(%arg0: i32) -> (i32, i32, i32) {
    %c0_i32 = arith.constant 0 : i32
    %c0_i32_0 = arith.constant 0 : i32
    %c0_i32_1 = arith.constant 0 : i32
    return %arg0, %c0_i32, %c0_i32_0 : i32, i32, i32
  }
  func.func @transform_1(%arg0: i32) -> (i32, i32) {
    %c0_i32 = arith.constant 0 : i32
    %c0_i32_0 = arith.constant 0 : i32
    %c0_i32_1 = arith.constant 0 : i32
    return %c0_i32, %c0_i32_0 : i32, i32
  }
  func.func @transform_2(%arg0: i32) -> (i32, i32) {
    %c0_i32 = arith.constant 0 : i32
    %c0_i32_0 = arith.constant 0 : i32
    %c0_i32_1 = arith.constant 0 : i32
    return %c0_i32, %c0_i32_0 : i32, i32
  }
  func.func @transform_3(%arg0: i32) -> (i32, i32) {
    %c0_i32 = arith.constant 0 : i32
    %c0_i32_0 = arith.constant 0 : i32
    %c0_i32_1 = arith.constant 0 : i32
    return %c0_i32, %c0_i32_0 : i32, i32
  }
  func.func @transform_4(%arg0: i32) -> (i32, i32, i32) {
    %c0_i32 = arith.constant 0 : i32
    %c0_i32_0 = arith.constant 0 : i32
    %c0_i32_1 = arith.constant 0 : i32
    return %arg0, %c0_i32, %c0_i32_0 : i32, i32, i32
  }
  func.func @transform_5(%arg0: i32) -> (i32, i32, i32) {
    %c0_i32 = arith.constant 0 : i32
    %c0_i32_0 = arith.constant 0 : i32
    %c0_i32_1 = arith.constant 0 : i32
    return %arg0, %c0_i32, %c0_i32_0 : i32, i32, i32
  }
}

</mosaic_0001>

<bundles_post_ra>
// kernel: tpu_custom_call.1
= control target key start
LH: loop header
LB: loop body
LE: loop exit
PB: predicated region body
PF: predicated region fallthrough
CT: control target
= control target key end

     0   :  { %11 = vsyncpa [#allocation3], 0  ;;  %s1938_s0 = inlined_call_operand.hbm [shape: f32[2,8,32], index: 0, kind: input, shape index: {}]   ;;  %s1939_s1 = inlined_call_operand.hbm [shape: f32[32,256], index: 1, kind: input, shape index: {}]   ;;  %s1940_s2 = inlined_call_operand.vmem [shape: f32[1,256], index: 2, kind: input, shape index: {}]   ;;  %s1941_s3 = inlined_call_operand.hbm [shape: f32[128,1024], index: 3, kind: input, shape index: {}]   ;;  %s1942_s4 = inlined_call_operand.vmem [shape: f32[2,64,8], index: 4, kind: output, shape index: {0}]   ;;  %s1943_s5 = inlined_call_operand.hbm [shape: s32[2,8,8], index: 5, kind: output, shape index: {1}]  }
   0x1   :  { %13 = vsyncpa [#allocation3 + $0x1], 0 }
   0x2   :  { %14 = vsyncpa [#allocation6], 0 }
   0x3   :  { %15 = vsyncpa [#allocation4], 0 }
   0x4   :  { %17 = vsyncpa [#allocation4 + $0x1], 0  ;;  %s1671_s18 = smov 0   ;;  %s1673_s19 = smov 0  }
   0x5   :  { %s1675_s20 = smov 0   ;;  %s1677_s21 = smov 0  }
   0x6 LB: > { %s1692_s22 = sadd.s32 4294967295, %s1629_s21   ;;  %s1363_s23 = sadd.s32 4294967294, %s1629_s21   ;;  %s1629_s21 = sphi %s1677_s21, %s1965_s21   ;;  %s1625_s20 = sphi %s1675_s20, %s1964_s20   ;;  %s1621_s19 = sphi %s1673_s19, %s1963_s19   ;;  %s1617_s18 = sphi %s1671_s18, %s1962_s18  }
   0x7   : > { %p43_p0 = scmp.ne.s32.totalorder %s1621_s19, %s1617_s18  ;;  %p1944_p1 = scmp.eq.s32.totalorder %s1692_s22, 0 }
   0x8   : > { %p162_p3 = scmp.eq.s32.totalorder %s1363_s23, 1  ;;  %p1364_p5 = scmp.ge.s32.totalorder %s1629_s21, 1 }
   0x9   : > { %p1701_p4 = por %p1944_p1, %p43_p0  ;;  %p169_p7 = scmp.lt.s32.totalorder %s1629_s21, 3 }
   0xa   : > { %p1706_p6 = por %p162_p3, %p43_p0  ;;  %s1631_s27 = smov [#allocation5]  }
   0xb   : > { %s1948_s24 = scalar_select %p1701_p4, 1, 0 }
   0xc   : > { %s1949_s25 = scalar_select %p1706_p6, 1, 0 }
   0xd   : > { %p1711_p8 = pnand %p1364_p5, %p169_p7  ;;  %s181_s28 = sshll.u32 %s1631_s27, 4  ;;  %s182_s28 = int_to_ptr.vmem [resolvable:$true] %s181_s28 }
   0xe   : > { %s1632_s30 = smov [#allocation7]   ;;  %s1492_s7 = scalar_lea.vmem %s182_s28, 1024 }
   0xf   : > { %s1950_s26 = scalar_select %p1711_p8, 1, 0 }
  0x10   : > { %p1420_p9 = pneg %p1711_p8  ;;  %s197_s6 = sshll.u32 %s1632_s30, 4  ;;  %s198_s6 = int_to_ptr.vmem [resolvable:$true] %s197_s6 }
  0x11   : > { %p1493_p13 = scmp.ne.s32.totalorder %s182_s28, %s1492_s7  ;;  %p1500_p5 = scmp.lt.s32.totalorder %s182_s28, %s182_s28 }
  0x12   : > { %p1720_p11 = pnand %p1420_p9, %p1944_p1  ;;  %p1501_p7 = scmp.lt.s32.totalorder %s1492_s7, %s1492_s7 }
  0x14   : > { %p1483_p12 = pneg %p1720_p11  ;;  %p1502_p10 = por %p1501_p7, %p1500_p5 }
  0x16   : > { %p1495_p0 = pnand %p1493_p13, %p1483_p12 }
  0x18   : > { %p1496_p3 = pneg %p1495_p0 }
  0x1a   : > { %p1503_p9 = pnand %p1502_p10, %p1496_p3 }
  0x1c   : > { %1506 = shalt.err (!%p1503_p9)
}
  0x1d   : > { %s1633_s8 = smov 256   ;;  %s1634_s9 = smov 16  }
  0x1e   : > { %1423 = dma.hbm_to_vmem [thread:$0]  (!%p1720_p11), %s1939_s1, 1024, %s182_s28, [#allocation6], %s1633_s8, %s1633_s8, %s1634_s9  }
  0x1f   : > { %s1518_s12 = scalar_lea.vmem %s198_s6, 16384  ;;  %p1526_p2 = scmp.lt.s32.totalorder %s198_s6, %s198_s6 }
  0x20   : > { %p1519_p1 = scmp.ne.s32.totalorder %s198_s6, %s1518_s12  ;;  %p1527_p6 = scmp.lt.s32.totalorder %s1518_s12, %s1518_s12 }
  0x22   : > { %p1521_p13 = pnand %p1519_p1, %p1483_p12  ;;  %p1528_p5 = por %p1527_p6, %p1526_p2 }
  0x24   : > { %p1522_p0 = pneg %p1521_p13 }
  0x26   : > { %p1529_p10 = pnand %p1528_p5, %p1522_p0 }
  0x28   : > { %1532 = shalt.err (!%p1529_p10)
}
  0x29   : > { %s1635_s13 = smov 1024   ;;  %s1636_s14 = smov 64  }
  0x2a   : > { %1426 = dma.hbm_to_vmem [thread:$0]  (!%p1720_p11), %s1941_s3, 16384, %s198_s6, [#allocation6], %s1635_s13, %s1635_s13, %s1636_s14  }
  0x2b   : > { %s1743_s17 = sadd.s32 1, %s1629_s21   ;;  %s30_s27 = sadd.s32 1, %s1625_s20 }
  0x2c   : > { %s27_s23 = ssub.s32 %s1629_s21, %s1743_s17  ;;  %p37_p2 = scmp.ne.s32.totalorder %s1625_s20, %s1621_s19 }
  0x2d   : > { %p28_p1 = scmp.eq.s32.totalorder %s27_s23, 0  ;;  %p38_p6 = scmp.eq.s32.totalorder %s1629_s21, 0 }
  0x2e   : > { %p1952_p3 = scmp.eq.s32.totalorder %s1692_s22, 1  ;;  %p1437_p9 = scmp.lt.s32.totalorder %s1629_s21, 2 }
  0x2f   : > { %s1752_s28 = scalar_select %p28_p1, %s1625_s20, %s30_s27  }
  0x30   : > { %p39_p12 = por %p38_p6, %p37_p2  ;;  %p1756_p7 = por %p1952_p3, %p37_p2 }
  0x31   : > { %s211_s29 = sand.u32 1, %s1625_s20   ;;  %s1369_s6 = sshll.u32 %s1629_s21, 7 }
  0x32   : > { %s1953_s30 = scalar_select %p1756_p7, 1, 0 }
  0x33   : > { %s1368_s7 = sshll.u32 %s211_s29, 3  ;;  %s1766_s10 = scalar_lea.hbm %s1938_s0, %s1369_s6 }
  0x34   : > { %s215_s11 = scalar_lea.vmem [#allocation2], %s1368_s7  ;;  %p1768_p11 = pnand %p1437_p9, %p39_p12 }
  0x35   : > { %s222_s12 = sshll.u32 %s215_s11, 4  ;;  %s212_s14 = scalar_lea.sflag [#allocation3], %s211_s29  ;;  %s223_s12 = int_to_ptr.vmem [resolvable:$true] %s222_s12 }
  0x36   : > { %s1533_s15 = scalar_lea.hbm %s1766_s10, 128  ;;  %p1535_p0 = pneg %p1768_p11 }
  0x37   : > { %p1534_p13 = scmp.ne.s32.totalorder %s1766_s10, %s1533_s15  ;;  %s1538_s27 = scalar_lea.hbm %s1938_s0, 256 }
  0x38   : > { %p1539_p1 = scmp.lt.s32.totalorder %s1766_s10, %s1938_s0  ;;  %p1540_p2 = scmp.lt.s32.totalorder %s1538_s27, %s1533_s15 }
  0x39   : > { %p1536_p5 = pnand %p1535_p0, %p1534_p13 }
  0x3a   : > { %p1541_p6 = por %p1540_p2, %p1539_p1 }
  0x3b   : > { %p1537_p10 = pneg %p1536_p5 }
  0x3d   : > { %p1542_p12 = pnand %p1541_p6, %p1537_p10 }
  0x3f   : > { %1545 = shalt.err (!%p1542_p12)
}
  0x40   : > { %s1546_s8 = scalar_lea.vmem %s223_s12, 128  ;;  %s1637_s29 = smov [#allocation2]  }
  0x41   : > { %p1547_p3 = scmp.ne.s32.totalorder %s223_s12, %s1546_s8  ;;  %s1551_s9 = sshll.u32 %s1637_s29, 4  ;;  %s1552_s9 = int_to_ptr.vmem [resolvable:$false] %s1551_s9 }
  0x42   : > { %s1553_s11 = scalar_lea.vmem %s1552_s9, 256  ;;  %p1554_p13 = scmp.lt.s32.totalorder %s223_s12, %s1552_s9 }
  0x43   : > { %p1549_p9 = pnand %p1547_p3, %p1535_p0  ;;  %p1555_p5 = scmp.lt.s32.totalorder %s1553_s11, %s1546_s8 }
  0x45   : > { %p1550_p7 = pneg %p1549_p9  ;;  %p1556_p4 = por %p1555_p5, %p1554_p13 }
  0x47   : > { %p1557_p8 = pnand %p1556_p4, %p1550_p7 }
  0x49   : > { %1560 = shalt.err (!%p1557_p8)
}
  0x4a   : > { %1430 = dma.hbm_to_vmem [thread:$0]  (!%p1768_p11), %s1766_s10, 128, %s223_s12, %s212_s14  }
  0x4b   : > { %p1955_p10 = scmp.ne.s32.totalorder %s1950_s26, 0 }
  0x4c   : > { %s1789_s15 = sand.u32 (!%p1955_p10), 1, %s1621_s19   ;;  %p1956_p4 = scmp.ne.s32.totalorder (!%p1955_p10), %s1948_s24, 0 }
  0x4d   : > { %231 = sbr.rel (%p1955_p10) target bundleno = 790 (0x316), region = 36  ;;  %s1371_s16 = sshll.u32 (!%p1955_p10), %s1789_s15, 3 }
  0x4e   : > { %s234_s23 = scalar_lea.sflag (!%p1955_p10), [#allocation3], %s1789_s15  ;;  %s237_s27 = scalar_lea.vmem (!%p1955_p10), [#allocation2], %s1371_s16 }
  0x52   : > { %1604 = dma.done.wait (%p1956_p4), %s234_s23, 128  }
  0x53   : > { %1606 = vsyncadd (%p1956_p4), %s234_s23, 4294967168  ;;  %p1957_p8 = scmp.eq.s32.totalorder %s1692_s22, 0 }
  0x55   : > { %1608 = dma.done.wait (%p1957_p8), [#allocation6], 17408   ;;  %p1958_p7 = pmov %p1957_p8 }
  0x56   : > { %v1638_v0 = vmov 0.0   ;;  %v290_v1 = vld [vmem:[#allocation5 + $0x38] sm:$0xff]  ;;  %v289_v2 = vld [vmem:[#allocation5 + $0x30] sm:$0xff]  ;;  %v288_v3 = vld [vmem:[#allocation5 + $0x28] sm:$0xff]  ;;  %vm303_vm0 = vcmask 261120   ;;  %p277_p11 = scmp.lt.s32.totalorder %s1692_s22, 1 }
  0x57   : > { %1610 = vsyncadd (%p1958_p7), [#allocation6], 4294949888  ;;  %371 = vmatprep.mubr.f32.mxu0 %v1638_v0  ;;  %572 = vmatprep.mubr.f32.mxu1 %v1638_v0  ;;  %v287_v4 = vld [vmem:[#allocation5 + $0x20] sm:$0xff]  ;;  %v286_v5 = vld [vmem:[#allocation5 + $0x18] sm:$0xff]  ;;  %vm1049_vm1 = vcmask 64512   ;;  %s1379_s7 = sshll.u32 %s1692_s22, 7 }
  0x58   : > { %331 = vmatprep.subr.mxu0 %v290_v1  ;;  %v285_v6 = vld [vmem:[#allocation5 + $0x10] sm:$0xff]  ;;  %v501_v7 = vld [vmem:[#allocation7 + $0x3c8] sm:$0xff]  ;;  %v500_v8 = vld [vmem:[#allocation7 + $0x3c0] sm:$0xff]  ;;  %s278_s10 = scalar_select %p277_p11, %s1692_s22, 1 }
  0x59   : > { %332 = vmatpush1.msra.mxu0 %v289_v2  ;;  %v284_v9 = vld [vmem:[#allocation5 + $0x8] sm:$0xff]  ;;  %508 = vmatprep.subr.mxu1 %v501_v7  ;;  %v283_v11 = vld [vmem:[#allocation5] sm:$0xff]  ;;  %v282_v14 = vld [vmem:[%s237_s27] sm:$0xff]  ;;  %s276_s8 = scalar_lea.vmem [#allocation8], %s1371_s16  ;;  %s1900_s23 = scalar_lea.hbm %s1943_s5, %s1379_s7 }
  0x5a   : > { %333 = vmatprep.subr.mxu0 %v288_v3  ;;  %v493_v10 = vld [vmem:[#allocation7 + $0x388] sm:$0xff]  ;;  %509 = vmatpush1.msra.mxu1 %v500_v8  ;;  %v492_v12 = vld [vmem:[#allocation7 + $0x380] sm:$0xff]  ;;  %v503_v15 = vld [vmem:[#allocation7 + $0x3d8] sm:$0xff]  ;;  %s1382_s12 = sshll.u32 %s278_s10, 6  ;;  %s1249_s29 = sshll.u32 %s276_s8, 4  ;;  %s1250_s29 = int_to_ptr.vmem [resolvable:$true] %s1249_s29 }
  0x5b   : > { %334 = vmatpush1.msra.mxu0 %v287_v4  ;;  %v485_v13 = vld [vmem:[#allocation7 + $0x348] sm:$0xff]  ;;  %510 = vmatprep.subr.mxu1 %v493_v10  ;;  %v502_v16 = vld [vmem:[#allocation7 + $0x3d0] sm:$0xff]  ;;  %v484_v17 = vld [vmem:[#allocation7 + $0x340] sm:$0xff]  ;;  %s1831_s6 = scalar_lea.vmem %s1942_s4, %s1382_s12  ;;  %s1233_s22 = scalar_lea.sflag [#allocation4], %s1789_s15 }
  0x5c   : > { %335 = vmatprep.subr.mxu0 %v286_v5  ;;  %511 = vmatpush1.msra.mxu1 %v492_v12  ;;  %v495_v18 = vld [vmem:[#allocation7 + $0x398] sm:$0xff]  ;;  %v477_v19 = vld [vmem:[#allocation7 + $0x308] sm:$0xff]  ;;  %v494_v20 = vld [vmem:[#allocation7 + $0x390] sm:$0xff]  ;;  %s1561_s16 = scalar_lea.vmem %s1250_s29, 128  ;;  %p1959_p1 = scmp.ne.s32.totalorder %s1953_s30, 0 }
  0x5d   : > { %336 = vmatpush1.msra.mxu0 %v285_v6  ;;  %512 = vmatprep.subr.mxu1 %v485_v13  ;;  %v476_v21 = vld [vmem:[#allocation7 + $0x300] sm:$0xff]  ;;  %v487_v22 = vld [vmem:[#allocation7 + $0x358] sm:$0xff]  ;;  %v469_v23 = vld [vmem:[#allocation7 + $0x2c8] sm:$0xff]  ;;  %v293_v13 = vlaneseq  ;;  %p1562_p0 = scmp.ne.s32.totalorder %s1250_s29, %s1561_s16  ;;  %s1640_s27 = smov [#allocation8]  }
  0x5e   : > { %337 = vmatprep.subr.mxu0 %v284_v9  ;;  %513 = vmatpush1.msra.mxu1 %v484_v17  ;;  %v486_v24 = vld [vmem:[#allocation7 + $0x350] sm:$0xff]  ;;  %v468_v25 = vld [vmem:[#allocation7 + $0x2c0] sm:$0xff]  ;;  %v479_v26 = vld [vmem:[#allocation7 + $0x318] sm:$0xff]  ;;  %s1565_s24 = sshll.u32 %s1640_s27, 4  ;;  %s1566_s24 = int_to_ptr.vmem [resolvable:$false] %s1565_s24 }
  0x5f   : > { %338 = vmatpush1.msra.mxu0 %v283_v11  ;;  %514 = vmatprep.subr.mxu1 %v477_v19  ;;  %v461_v27 = vld [vmem:[#allocation7 + $0x288] sm:$0xff]  ;;  %v478_v28 = vld [vmem:[#allocation7 + $0x310] sm:$0xff]  ;;  %v460_v29 = vld [vmem:[#allocation7 + $0x280] sm:$0xff]  ;;  %p1563_p2 = pnand %p1562_p0, %p1959_p1  ;;  %s1567_s26 = scalar_lea.vmem %s1566_s24, 256 }
  0x60   : > { %1377 = vmatmul.mubr.msk.f32.vlgmr.msra.gmra.mxu0 %vm303_vm0, %v282_v14  ;;  %579 = vmatprep.subr.mxu0 %v503_v15  ;;  %v471_v30 = vld [vmem:[#allocation7 + $0x2d8] sm:$0xff]  ;;  %v453_v31 = vld [vmem:[#allocation7 + $0x248] sm:$0xff]  ;;  %v470_v32 = vld [vmem:[#allocation7 + $0x2d0] sm:$0xff]  ;;  %v1806_v14 = vshrl.u32 %v293_v13, 7  ;;  %p1568_p12 = scmp.lt.s32.totalorder %s1250_s29, %s1566_s24  ;;  %p1569_p3 = scmp.lt.s32.totalorder %s1567_s26, %s1561_s16 }
  0x61   : > { %580 = vmatpush1.msra.mxu0 %v502_v16  ;;  %515 = vmatpush1.msra.mxu1 %v476_v21  ;;  %v452_v33 = vld [vmem:[#allocation7 + $0x240] sm:$0xff]  ;;  %v463_v34 = vld [vmem:[#allocation7 + $0x298] sm:$0xff]  ;;  %v445_v35 = vld [vmem:[#allocation7 + $0x208] sm:$0xff]  ;;  %p1564_p6 = pneg %p1563_p2 }
  0x62   : > { %581 = vmatprep.subr.mxu0 %v495_v18  ;;  %516 = vmatprep.subr.mxu1 %v469_v23  ;;  %v462_v36 = vld [vmem:[#allocation7 + $0x290] sm:$0xff]  ;;  %v444_v37 = vld [vmem:[#allocation7 + $0x200] sm:$0xff]  ;;  %v455_v38 = vld [vmem:[#allocation7 + $0x258] sm:$0xff]  ;;  %v295_v15 = vsub.s32 0, %v1806_v14  ;;  %p1570_p9 = por %p1569_p3, %p1568_p12 }
  0x63   : > { %582 = vmatpush1.msra.mxu0 %v494_v20  ;;  %517 = vmatpush1.msra.mxu1 %v468_v25  ;;  %v437_v39 = vld [vmem:[#allocation7 + $0x1c8] sm:$0xff]  ;;  %v454_v40 = vld [vmem:[#allocation7 + $0x250] sm:$0xff]  ;;  %v436_v41 = vld [vmem:[#allocation7 + $0x1c0] sm:$0xff] }
  0x64   : > { %583 = vmatprep.subr.mxu0 %v487_v22  ;;  %518 = vmatprep.subr.mxu1 %v461_v27  ;;  %v447_v42 = vld [vmem:[#allocation7 + $0x218] sm:$0xff]  ;;  %v429_v43 = vld [vmem:[#allocation7 + $0x188] sm:$0xff]  ;;  %v446_v44 = vld [vmem:[#allocation7 + $0x210] sm:$0xff]  ;;  %p1571_p13 = pnand %p1570_p9, %p1564_p6 }
  0x65   : > { %584 = vmatpush1.msra.mxu0 %v486_v24  ;;  %519 = vmatpush1.msra.mxu1 %v460_v29  ;;  %v428_v45 = vld [vmem:[#allocation7 + $0x180] sm:$0xff]  ;;  %v439_v46 = vld [vmem:[#allocation7 + $0x1d8] sm:$0xff]  ;;  %v421_v47 = vld [vmem:[#allocation7 + $0x148] sm:$0xff] }
  0x66   : > { %585 = vmatprep.subr.mxu0 %v479_v26  ;;  %520 = vmatprep.subr.mxu1 %v453_v31  ;;  %v438_v48 = vld [vmem:[#allocation7 + $0x1d0] sm:$0xff]  ;;  %v420_v49 = vld [vmem:[#allocation7 + $0x140] sm:$0xff]  ;;  %v431_v50 = vld [vmem:[#allocation7 + $0x198] sm:$0xff] }
  0x67   : > { %586 = vmatpush1.msra.mxu0 %v478_v28  ;;  %521 = vmatpush1.msra.mxu1 %v452_v33  ;;  %v413_v51 = vld [vmem:[#allocation7 + $0x108] sm:$0xff]  ;;  %v430_v52 = vld [vmem:[#allocation7 + $0x190] sm:$0xff]  ;;  %v412_v53 = vld [vmem:[#allocation7 + $0x100] sm:$0xff] }
  0x68   : > { %587 = vmatprep.subr.mxu0 %v471_v30  ;;  %522 = vmatprep.subr.mxu1 %v445_v35  ;;  %v423_v54 = vld [vmem:[#allocation7 + $0x158] sm:$0xff]  ;;  %v405_v55 = vld [vmem:[#allocation7 + $0xc8] sm:$0xff]  ;;  %v422_v56 = vld [vmem:[#allocation7 + $0x150] sm:$0xff] }
  0x69   : > { %588 = vmatpush1.msra.mxu0 %v470_v32  ;;  %523 = vmatpush1.msra.mxu1 %v444_v37  ;;  %v404_v57 = vld [vmem:[#allocation7 + $0xc0] sm:$0xff]  ;;  %v415_v58 = vld [vmem:[#allocation7 + $0x118] sm:$0xff]  ;;  %v397_v59 = vld [vmem:[#allocation7 + $0x88] sm:$0xff] }
  0x6a   : > { %589 = vmatprep.subr.mxu0 %v463_v34  ;;  %524 = vmatprep.subr.mxu1 %v437_v39  ;;  %v414_v60 = vld [vmem:[#allocation7 + $0x110] sm:$0xff]  ;;  %v396_v61 = vld [vmem:[#allocation7 + $0x80] sm:$0xff]  ;;  %v407_v62 = vld [vmem:[#allocation7 + $0xd8] sm:$0xff] }
  0x6b   : > { %590 = vmatpush1.msra.mxu0 %v462_v36  ;;  %525 = vmatpush1.msra.mxu1 %v436_v41  ;;  %v406_v63 = vld [vmem:[#allocation7 + $0xd0] sm:$0xff]  ;;  %v399_v1 = vld [vmem:[#allocation7 + $0x98] sm:$0xff]  ;;  %v389_v3 = vld [vmem:[#allocation7 + $0x48] sm:$0xff] }
  0x6c   : > { %591 = vmatprep.subr.mxu0 %v455_v38  ;;  %526 = vmatprep.subr.mxu1 %v429_v43  ;;  %v398_v2 = vld [vmem:[#allocation7 + $0x90] sm:$0xff]  ;;  %v391_v4 = vld [vmem:[#allocation7 + $0x58] sm:$0xff]  ;;  %v388_v5 = vld [vmem:[#allocation7 + $0x40] sm:$0xff] }
  0x6d   : > { %592 = vmatpush1.msra.mxu0 %v454_v40  ;;  %527 = vmatpush1.msra.mxu1 %v428_v45  ;;  %v390_v6 = vld [vmem:[#allocation7 + $0x50] sm:$0xff]  ;;  %v381_v7 = vld [vmem:[#allocation7 + $0x8] sm:$0xff]  ;;  %v383_v8 = vld [vmem:[#allocation7 + $0x18] sm:$0xff] }
  0x6e   : > { %593 = vmatprep.subr.mxu0 %v447_v42  ;;  %528 = vmatprep.subr.mxu1 %v421_v47  ;;  %v380_v9 = vld [vmem:[#allocation7] sm:$0xff]  ;;  %v382_v10 = vld [vmem:[#allocation7 + $0x10] sm:$0xff]  ;;  %v505_v11 = vld [vmem:[#allocation7 + $0x3e8] sm:$0xff] }
  0x6f   : > { %594 = vmatpush1.msra.mxu0 %v446_v44  ;;  %529 = vmatpush1.msra.mxu1 %v420_v49  ;;  %v507_v12 = vld [vmem:[#allocation7 + $0x3f8] sm:$0xff]  ;;  %v1812_v16 = vld [vmem:[%s1940_s2] sm:$0x3]  ;;  %v504_v21 = vld [vmem:[#allocation7 + $0x3e0] sm:$0xff] }
  0x70   : > { %595 = vmatprep.subr.mxu0 %v439_v46  ;;  %530 = vmatprep.subr.mxu1 %v413_v51  ;;  %v296_v17 = vrot.slane %v1812_v16, %v295_v15  ;;  %v506_v22 = vld [vmem:[#allocation7 + $0x3f0] sm:$0xff]  ;;  %v497_v23 = vld [vmem:[#allocation7 + $0x3a8] sm:$0xff]  ;;  %v499_v24 = vld [vmem:[#allocation7 + $0x3b8] sm:$0xff] }
  0x71   : > { %596 = vmatpush1.msra.mxu0 %v438_v48  ;;  %531 = vmatpush1.msra.mxu1 %v412_v53  ;;  %v496_v25 = vld [vmem:[#allocation7 + $0x3a0] sm:$0xff]  ;;  %v498_v26 = vld [vmem:[#allocation7 + $0x3b0] sm:$0xff]  ;;  %v489_v27 = vld [vmem:[#allocation7 + $0x368] sm:$0xff] }
  0x72   : > { %597 = vmatprep.subr.mxu0 %v431_v50  ;;  %532 = vmatprep.subr.mxu1 %v405_v55  ;;  %v491_v28 = vld [vmem:[#allocation7 + $0x378] sm:$0xff]  ;;  %v488_v29 = vld [vmem:[#allocation7 + $0x360] sm:$0xff]  ;;  %v490_v30 = vld [vmem:[#allocation7 + $0x370] sm:$0xff] }
  0x73   : > { %598 = vmatpush1.msra.mxu0 %v430_v52  ;;  %533 = vmatpush1.msra.mxu1 %v404_v57  ;;  %v481_v31 = vld [vmem:[#allocation7 + $0x328] sm:$0xff]  ;;  %v483_v32 = vld [vmem:[#allocation7 + $0x338] sm:$0xff]  ;;  %v480_v33 = vld [vmem:[#allocation7 + $0x320] sm:$0xff] }
  0x74   : > { %599 = vmatprep.subr.mxu0 %v423_v54  ;;  %534 = vmatprep.subr.mxu1 %v397_v59  ;;  %v482_v34 = vld [vmem:[#allocation7 + $0x330] sm:$0xff]  ;;  %v473_v35 = vld [vmem:[#allocation7 + $0x2e8] sm:$0xff]  ;;  %v475_v36 = vld [vmem:[#allocation7 + $0x2f8] sm:$0xff] }
  0x75   : > { %600 = vmatpush1.msra.mxu0 %v422_v56  ;;  %535 = vmatpush1.msra.mxu1 %v396_v61  ;;  %v472_v37 = vld [vmem:[#allocation7 + $0x2e0] sm:$0xff]  ;;  %v474_v38 = vld [vmem:[#allocation7 + $0x2f0] sm:$0xff]  ;;  %v465_v39 = vld [vmem:[#allocation7 + $0x2a8] sm:$0xff] }
  0x76   : > { %601 = vmatprep.subr.mxu0 %v415_v58  ;;  %643 = vmatprep.mubr.f32.mxu0 %v1638_v0  ;;  %v467_v40 = vld [vmem:[#allocation7 + $0x2b8] sm:$0xff]  ;;  %v464_v41 = vld [vmem:[#allocation7 + $0x2a0] sm:$0xff]  ;;  %v466_v42 = vld [vmem:[#allocation7 + $0x2b0] sm:$0xff] }
  0x77   : > { %602 = vmatpush1.msra.mxu0 %v414_v60  ;;  %536 = vmatprep.subr.mxu1 %v389_v3  ;;  %v457_v43 = vld [vmem:[#allocation7 + $0x268] sm:$0xff]  ;;  %v459_v44 = vld [vmem:[#allocation7 + $0x278] sm:$0xff]  ;;  %v456_v45 = vld [vmem:[#allocation7 + $0x260] sm:$0xff] }
  0x78   : > { %603 = vmatprep.subr.mxu0 %v407_v62  ;;  %537 = vmatpush1.msra.mxu1 %v388_v5  ;;  %v458_v46 = vld [vmem:[#allocation7 + $0x270] sm:$0xff]  ;;  %v449_v47 = vld [vmem:[#allocation7 + $0x228] sm:$0xff]  ;;  %v451_v48 = vld [vmem:[#allocation7 + $0x238] sm:$0xff] }
  0x79   : > { %604 = vmatpush1.msra.mxu0 %v406_v63  ;;  %538 = vmatprep.subr.mxu1 %v381_v7  ;;  %v448_v49 = vld [vmem:[#allocation7 + $0x220] sm:$0xff]  ;;  %v450_v50 = vld [vmem:[#allocation7 + $0x230] sm:$0xff]  ;;  %v441_v51 = vld [vmem:[#allocation7 + $0x1e8] sm:$0xff] }
  0x7a   : > { %605 = vmatprep.subr.mxu0 %v399_v1  ;;  %539 = vmatpush1.msra.mxu1 %v380_v9  ;;  %v443_v52 = vld [vmem:[#allocation7 + $0x1f8] sm:$0xff]  ;;  %v440_v53 = vld [vmem:[#allocation7 + $0x1e0] sm:$0xff]  ;;  %v442_v54 = vld [vmem:[#allocation7 + $0x1f0] sm:$0xff] }
  0x7b   : > { %606 = vmatpush1.msra.mxu0 %v398_v2  ;;  %650 = vmatprep.subr.mxu1 %v505_v11  ;;  %v433_v55 = vld [vmem:[#allocation7 + $0x1a8] sm:$0xff]  ;;  %v435_v56 = vld [vmem:[#allocation7 + $0x1b8] sm:$0xff]  ;;  %v432_v57 = vld [vmem:[#allocation7 + $0x1a0] sm:$0xff]  ;;  %v299_v2 = vsub.s32 1, %v1806_v14 }
  0x7c   : > { %607 = vmatprep.subr.mxu0 %v391_v4  ;;  %v434_v58 = vld [vmem:[#allocation7 + $0x1b0] sm:$0xff]  ;;  %v425_v59 = vld [vmem:[#allocation7 + $0x168] sm:$0xff]  ;;  %v427_v60 = vld [vmem:[#allocation7 + $0x178] sm:$0xff] }
  0x7d   : > { %608 = vmatpush1.msra.mxu0 %v390_v6  ;;  %v424_v61 = vld [vmem:[#allocation7 + $0x160] sm:$0xff]  ;;  %v426_v62 = vld [vmem:[#allocation7 + $0x170] sm:$0xff]  ;;  %v417_v63 = vld [vmem:[#allocation7 + $0x128] sm:$0xff]  ;;  %v300_v11 = vrot.slane %v1812_v16, %v299_v2 }
  0x7e   : > { %609 = vmatprep.subr.mxu0 %v383_v8  ;;  %v419_v1 = vld [vmem:[#allocation7 + $0x138] sm:$0xff]  ;;  %v416_v3 = vld [vmem:[#allocation7 + $0x120] sm:$0xff]  ;;  %v418_v4 = vld [vmem:[#allocation7 + $0x130] sm:$0xff] }
  0x7f   : > { %610 = vmatpush1.msra.mxu0 %v382_v10  ;;  %v409_v5 = vld [vmem:[#allocation7 + $0xe8] sm:$0xff]  ;;  %v411_v6 = vld [vmem:[#allocation7 + $0xf8] sm:$0xff]  ;;  %v408_v7 = vld [vmem:[#allocation7 + $0xe0] sm:$0xff] }
  0x80   : > { %721 = vmatprep.subr.mxu0 %v507_v12  ;;  %v410_v8 = vld [vmem:[#allocation7 + $0xf0] sm:$0xff]  ;;  %v401_v9 = vld [vmem:[#allocation7 + $0xa8] sm:$0xff]  ;;  %v403_v10 = vld [vmem:[#allocation7 + $0xb8] sm:$0xff] }
  0x81   : > { %v400_v12 = vld [vmem:[#allocation7 + $0xa0] sm:$0xff]  ;;  %v402_v13 = vld [vmem:[#allocation7 + $0xb0] sm:$0xff] }
  0x82   : > { %v384_v16 = vld [vmem:[#allocation7 + $0x20] sm:$0xff] }
 0x120   : > { %v373_v18 = vpop.f32.mrf.mxu0 }
 0x121   : > { %v374_v19 = vadd.f32 %v373_v18, %v296_v17  ;;  %v393_v17 = vld [vmem:[#allocation7 + $0x68] sm:$0xff]  ;;  %v395_v18 = vld [vmem:[#allocation7 + $0x78] sm:$0xff] }
 0x122   : > { %v375_v15 = vpop.f32.mrf.mxu0 }
 0x123   : > { %v1815_v20 = vmax.f32 %v374_v19, 0.0  ;;  %v392_v19 = vld [vmem:[#allocation7 + $0x60] sm:$0xff] }
 0x125   : > { %573 = vmatmul.mubr.f32.vlgmr.msra.gmra.mxu1 %v1815_v20  ;;  %644 = vmatmul.mubr.f32.vlgmr.msra.gmra.mxu0 %v1815_v20 }
 0x126   : > { %651 = vmatpush1.msra.mxu1 %v504_v21  ;;  %722 = vmatpush1.msra.mxu0 %v506_v22  ;;  %v394_v21 = vld [vmem:[#allocation7 + $0x70] sm:$0xff]  ;;  %v385_v22 = vld [vmem:[#allocation7 + $0x28] sm:$0xff] }
 0x127   : > { %652 = vmatprep.subr.mxu1 %v497_v23  ;;  %723 = vmatprep.subr.mxu0 %v499_v24  ;;  %v387_v23 = vld [vmem:[#allocation7 + $0x38] sm:$0xff]  ;;  %v376_v24 = vadd.f32 %v375_v15, %v300_v11 }
 0x128   : > { %653 = vmatpush1.msra.mxu1 %v496_v25  ;;  %724 = vmatpush1.msra.mxu0 %v498_v26  ;;  %v386_v25 = vld [vmem:[#allocation7 + $0x30] sm:$0xff] }
 0x129   : > { %654 = vmatprep.subr.mxu1 %v489_v27  ;;  %725 = vmatprep.subr.mxu0 %v491_v28  ;;  %v379_v26 = vmax.f32 %v376_v24, 0.0  ;;  %v1639_v27 = vmov 1966171168  }
 0x12a   : > { %655 = vmatpush1.msra.mxu1 %v488_v29  ;;  %726 = vmatpush1.msra.mxu0 %v490_v30  ;;  %v809_v28 = vunpack.c.l.s4 %v1639_v27 }
 0x12b   : > { %656 = vmatprep.subr.mxu1 %v481_v31  ;;  %727 = vmatprep.subr.mxu0 %v483_v32 }
 0x12c   : > { %657 = vmatpush1.msra.mxu1 %v480_v33  ;;  %728 = vmatpush1.msra.mxu0 %v482_v34  ;;  %v810_v31 = vunpack.c.0.s8 %v809_v28 }
 0x12d   : > { %658 = vmatprep.subr.mxu1 %v473_v35  ;;  %729 = vmatprep.subr.mxu0 %v475_v36 }
 0x12e   : > { %659 = vmatpush1.msra.mxu1 %v472_v37  ;;  %730 = vmatpush1.msra.mxu0 %v474_v38  ;;  %v813_v34 = vsub.s32 %v810_v31, %v1806_v14 }
 0x12f   : > { %660 = vmatprep.subr.mxu1 %v465_v39  ;;  %731 = vmatprep.subr.mxu0 %v467_v40 }
 0x130   : > { %661 = vmatpush1.msra.mxu1 %v464_v41  ;;  %732 = vmatpush1.msra.mxu0 %v466_v42 }
 0x131   : > { %662 = vmatprep.subr.mxu1 %v457_v43  ;;  %733 = vmatprep.subr.mxu0 %v459_v44 }
 0x132   : > { %663 = vmatpush1.msra.mxu1 %v456_v45  ;;  %734 = vmatpush1.msra.mxu0 %v458_v46 }
 0x133   : > { %664 = vmatprep.subr.mxu1 %v449_v47  ;;  %735 = vmatprep.subr.mxu0 %v451_v48 }
 0x134   : > { %665 = vmatpush1.msra.mxu1 %v448_v49  ;;  %736 = vmatpush1.msra.mxu0 %v450_v50 }
 0x135   : > { %666 = vmatprep.subr.mxu1 %v441_v51  ;;  %737 = vmatprep.subr.mxu0 %v443_v52 }
 0x136   : > { %667 = vmatpush1.msra.mxu1 %v440_v53  ;;  %738 = vmatpush1.msra.mxu0 %v442_v54 }
 0x137   : > { %668 = vmatprep.subr.mxu1 %v433_v55  ;;  %739 = vmatprep.subr.mxu0 %v435_v56 }
 0x138   : > { %669 = vmatpush1.msra.mxu1 %v432_v57  ;;  %740 = vmatpush1.msra.mxu0 %v434_v58 }
 0x139   : > { %670 = vmatprep.subr.mxu1 %v425_v59  ;;  %741 = vmatprep.subr.mxu0 %v427_v60 }
 0x13a   : > { %671 = vmatpush1.msra.mxu1 %v424_v61  ;;  %742 = vmatpush1.msra.mxu0 %v426_v62 }
 0x13b   : > { %672 = vmatprep.subr.mxu1 %v417_v63  ;;  %743 = vmatprep.subr.mxu0 %v419_v1 }
 0x13c   : > { %673 = vmatpush1.msra.mxu1 %v416_v3  ;;  %744 = vmatpush1.msra.mxu0 %v418_v4 }
 0x13d   : > { %674 = vmatprep.subr.mxu1 %v409_v5  ;;  %745 = vmatprep.subr.mxu0 %v411_v6 }
 0x13e   : > { %675 = vmatpush1.msra.mxu1 %v408_v7  ;;  %746 = vmatpush1.msra.mxu0 %v410_v8 }
 0x13f   : > { %676 = vmatprep.subr.mxu1 %v401_v9  ;;  %747 = vmatprep.subr.mxu0 %v403_v10 }
 0x140   : > { %677 = vmatpush1.msra.mxu1 %v400_v12  ;;  %748 = vmatpush1.msra.mxu0 %v402_v13 }
 0x141   : > { %678 = vmatprep.subr.mxu1 %v393_v17  ;;  %749 = vmatprep.subr.mxu0 %v395_v18 }
 0x142   : > { %679 = vmatpush1.msra.mxu1 %v392_v19  ;;  %750 = vmatpush1.msra.mxu0 %v394_v21 }
 0x143   : > { %680 = vmatprep.subr.mxu1 %v385_v22  ;;  %751 = vmatprep.subr.mxu0 %v387_v23 }
 0x144   : > { %681 = vmatpush1.msra.mxu1 %v384_v16  ;;  %714 = vmatprep.mubr.f32.mxu1 %v1638_v0 }
 0x145   : > { %752 = vmatpush1.msra.mxu0 %v386_v25  ;;  %785 = vmatprep.mubr.f32.mxu0 %v1638_v0 }
 0x146   : > { %715 = vmatmul.mubr.f32.vlgmr.msra.gmra.mxu1 %v1815_v20  ;;  %786 = vmatmul.mubr.f32.vlgmr.msra.gmra.mxu0 %v1815_v20 }
 0x147   : > { %1392 = vmatprep.subr.mxu0 %v379_v26  ;;  %1406 = vmatprep.subr.mxu1 %v379_v26 }
 0x148   : > { %1393 = vmatpush3.xpose.msra.mxu0 %v379_v26  ;;  %1407 = vmatpush3.xpose.msra.mxu1 %v379_v26 }
 0x1e5   : > { %v574_v29 = vpop.f32.mrf.mxu1  ;;  %v645_v30 = vpop.f32.mrf.mxu0 }
 0x1e7   : > { %v576_v32 = vpop.f32.mrf.mxu1  ;;  %v647_v33 = vpop.f32.mrf.mxu0 }
 0x1e8   : > { %v800_v35 = vcombine.low %v574_v29, %v576_v32  ;;  %v802_v36 = vcombine.low %v645_v30, %v647_v33  ;;  %v801_v0 = vcombine.high %v574_v29, %v576_v32  ;;  %v803_v37 = vcombine.high %v645_v30, %v647_v33 }
 0x1ea   : > { %v814_v38 = vrot.slane %v800_v35, %v813_v34  ;;  %v828_v39 = vrot.slane %v802_v36, %v813_v34  ;;  %v821_v41 = vrot.slane %v801_v0, %v813_v34  ;;  %v835_v42 = vrot.slane %v803_v37, %v813_v34 }
 0x1ec   : > { %v864_v49 = vcombine.low %v814_v38, %v828_v39  ;;  %v865_v50 = vcombine.high %v814_v38, %v828_v39  ;;  %v866_v55 = vcombine.low %v821_v41, %v835_v42  ;;  %v867_v2 = vcombine.high %v821_v41, %v835_v42 }
 0x1ee   : > { %v892_v59 = vrot.slane %v865_v50, %v813_v34  ;;  %v878_v62 = vrot.slane %v864_v49, %v813_v34  ;;  %v885_v3 = vrot.slane %v866_v55, %v813_v34  ;;  %v899_v10 = vrot.slane %v867_v2, %v813_v34 }
 0x206   : > { %v716_v20 = vpop.f32.mrf.mxu1  ;;  %v787_v40 = vpop.f32.mrf.mxu0 }
 0x208   : > { %v718_v43 = vpop.f32.mrf.mxu1  ;;  %v789_v44 = vpop.f32.mrf.mxu0 }
 0x209   : > { %v804_v45 = vcombine.low %v716_v20, %v718_v43  ;;  %v805_v46 = vcombine.high %v716_v20, %v718_v43  ;;  %v806_v47 = vcombine.low %v787_v40, %v789_v44  ;;  %v807_v48 = vcombine.high %v787_v40, %v789_v44 }
 0x20b   : > { %v842_v51 = vrot.slane %v804_v45, %v813_v34  ;;  %v849_v52 = vrot.slane %v805_v46, %v813_v34  ;;  %v856_v53 = vrot.slane %v806_v47, %v813_v34  ;;  %v863_v54 = vrot.slane %v807_v48, %v813_v34 }
 0x20d   : > { %v868_v56 = vcombine.low %v842_v51, %v856_v53  ;;  %v869_v57 = vcombine.high %v842_v51, %v856_v53  ;;  %v870_v58 = vcombine.low %v849_v52, %v863_v54  ;;  %v871_v60 = vcombine.high %v849_v52, %v863_v54 }
 0x20f   : > { %v920_v61 = vrot.slane %v869_v57, %v813_v34  ;;  %v906_v63 = vrot.slane %v868_v56, %v813_v34  ;;  %v913_v1 = vrot.slane %v870_v58, %v813_v34  ;;  %v927_v8 = vrot.slane %v871_v60, %v813_v34 }
 0x211   : > { %v928_v4 = vcombine.low %v878_v62, %v906_v63  ;;  %v929_v5 = vcombine.high %v878_v62, %v906_v63  ;;  %v932_v6 = vcombine.low %v892_v59, %v920_v61  ;;  %v933_v7 = vcombine.high %v892_v59, %v920_v61 }
 0x212   : > { %v930_v9 = vcombine.low %v885_v3, %v913_v1  ;;  %v934_v11 = vcombine.low %v899_v10, %v927_v8  ;;  %v931_v12 = vcombine.high %v885_v3, %v913_v1  ;;  %v935_v13 = vcombine.high %v899_v10, %v927_v8 }
 0x213   : > { %1394 = vmatprep.mubr.f32.mxu0 %v928_v4  ;;  %1397 = vmatprep.mubr.f32.mxu1 %v929_v5 }
 0x214   : > { %1395 = vmatmul.mubr.f32.vlgmr.msra.gmra.mxu0 %v932_v6  ;;  %1398 = vmatmul.mubr.f32.vlgmr.msra.gmra.mxu1 %v933_v7 }
 0x215   : > { %1400 = vmatprep.mubr.f32.mxu1 %v930_v9 }
 0x218   : > { %1401 = vmatmul.mubr.f32.gmra.mxu1 %v934_v11 }
 0x219   : > { %1403 = vmatprep.mubr.f32.mxu1 %v931_v12 }
 0x21c   : > { %1404 = vmatmul.mubr.f32.gmra.mxu1 %v935_v13 }
 0x2d4   : > { %v1396_v15 = vpop.f32.mrf.mxu0  ;;  %v1399_v17 = vpop.f32.mrf.mxu1 }
 0x2d5   : > { %1051 = vst.msk [vmem:[%s1831_s6 + $0x8] sm:$0xff] %vm1049_vm1, %v1396_v15  ;;  %v1065_v18 = vsel %vm1049_vm1, %v1396_v15, -inf  ;;  %1053 = vst.msk [vmem:[%s1831_s6 + $0x18] sm:$0xff] %vm1049_vm1, %v1399_v17  ;;  %v1079_v19 = vsel %vm1049_vm1, %v1399_v17, -inf }
 0x2d6   : > { %v1066_v21 = vrot.slane %v1065_v18, 4  ;;  %v1080_v22 = vrot.slane %v1079_v19, 4  ;;  %v1010_v23 = vpop.f32.mrf.mxu0  ;;  %v1020_v24 = vpop.f32.mrf.mxu1 }
 0x2d7   : > { %1050 = vst.msk [vmem:[%s1831_s6] sm:$0xff] %vm1049_vm1, %v1010_v23  ;;  %v1058_v16 = vsel %vm1049_vm1, %v1010_v23, -inf  ;;  %1052 = vst.msk [vmem:[%s1831_s6 + $0x10] sm:$0xff] %vm1049_vm1, %v1020_v24  ;;  %v1072_v25 = vsel %vm1049_vm1, %v1020_v24, -inf }
 0x2d8   : > { %v1067_v26 = vmax.f32 %v1065_v18, %v1066_v21  ;;  %v1081_v27 = vmax.f32 %v1079_v19, %v1080_v22  ;;  %v1059_v28 = vrot.slane %v1058_v16, 4  ;;  %v1073_v29 = vrot.slane %v1072_v25, 4  ;;  %v1845_v30 = vpop.f32.mrf.mxu1 }
 0x2d9   : > { %1055 = vst.msk [vmem:[%s1831_s6 + $0x28] sm:$0xff] %vm1049_vm1, %v1845_v30  ;;  %v1093_v31 = vsel %vm1049_vm1, %v1845_v30, -inf }
 0x2da   : > { %v1068_v32 = vrot.slane %v1067_v26, 2  ;;  %v1082_v33 = vrot.slane %v1081_v27, 2  ;;  %v1060_v34 = vmax.f32 %v1058_v16, %v1059_v28  ;;  %v1074_v35 = vmax.f32 %v1072_v25, %v1073_v29  ;;  %v1852_v36 = vpop.f32.mrf.mxu1 }
 0x2db   : > { %v1094_v0 = vrot.slane %v1093_v31, 4  ;;  %1054 = vst.msk [vmem:[%s1831_s6 + $0x20] sm:$0xff] %vm1049_vm1, %v1852_v36  ;;  %v1086_v37 = vsel %vm1049_vm1, %v1852_v36, -inf }
 0x2dc   : > { %v1069_v38 = vmax.f32 %v1067_v26, %v1068_v32  ;;  %v1083_v39 = vmax.f32 %v1081_v27, %v1082_v33  ;;  %v1061_v20 = vrot.slane %v1060_v34, 2  ;;  %v1075_v40 = vrot.slane %v1074_v35, 2  ;;  %v1859_v41 = vpop.f32.mrf.mxu1 }
 0x2dd   : > { %v1095_v42 = vmax.f32 %v1093_v31, %v1094_v0  ;;  %v1087_v43 = vrot.slane %v1086_v37, 4  ;;  %1057 = vst.msk [vmem:[%s1831_s6 + $0x38] sm:$0xff] %vm1049_vm1, %v1859_v41  ;;  %v1107_v1 = vsel %vm1049_vm1, %v1859_v41, -inf }
 0x2de   : > { %v1070_v44 = vrot.slane %v1069_v38, 1  ;;  %v1084_v45 = vrot.slane %v1083_v39, 1  ;;  %v1062_v46 = vmax.f32 %v1060_v34, %v1061_v20  ;;  %v1076_v47 = vmax.f32 %v1074_v35, %v1075_v40  ;;  %v1864_v48 = vpop.f32.mrf.mxu1 }
 0x2df   : > { %v1096_v49 = vrot.slane %v1095_v42, 2  ;;  %v1088_v50 = vmax.f32 %v1086_v37, %v1087_v43  ;;  %1056 = vst.msk [vmem:[%s1831_s6 + $0x30] sm:$0xff] %vm1049_vm1, %v1864_v48  ;;  %v1100_v16 = vsel %vm1049_vm1, %v1864_v48, -inf }
 0x2e0   : > { %v1071_v51 = vmax.f32 %v1069_v38, %v1070_v44  ;;  %v1085_v52 = vmax.f32 %v1083_v39, %v1084_v45  ;;  %v1063_v53 = vrot.slane %v1062_v46, 1  ;;  %v1077_v54 = vrot.slane %v1076_v47, 1 }
 0x2e1   : > { %v1097_v55 = vmax.f32 %v1095_v42, %v1096_v49  ;;  %v1089_v56 = vrot.slane %v1088_v50, 2  ;;  %v1101_v31 = vrot.slane %v1100_v16, 4 }
 0x2e2   : > { %vm1117_vm2 = vcmp.eq.f32.partialorder %v1396_v15, %v1071_v51  ;;  %vm1119_vm3 = vcmp.eq.f32.partialorder %v1399_v17, %v1085_v52  ;;  %v1064_v57 = vmax.f32 %v1062_v46, %v1063_v53  ;;  %v1078_v58 = vmax.f32 %v1076_v47, %v1077_v54 }
 0x2e3   : > { %v1125_v59 = vsel %vm1117_vm2, %v1806_v14, 8  ;;  %v1127_v60 = vsel %vm1119_vm3, %v1806_v14, 8  ;;  %v1098_v61 = vrot.slane %v1097_v55, 1  ;;  %v1090_v62 = vmax.f32 %v1088_v50, %v1089_v56 }
 0x2e4   : > { %v1142_v63 = vsel %vm1049_vm1, %v1125_v59, 2147483647  ;;  %vm1116_vm4 = vcmp.eq.f32.partialorder %v1010_v23, %v1064_v57  ;;  %vm1118_vm5 = vcmp.eq.f32.partialorder %v1020_v24, %v1078_v58  ;;  %v1162_v3 = vsel %vm1049_vm1, %v1127_v60, 2147483647 }
 0x2e5   : > { %v1143_v2 = vrot.slane %v1142_v63, 4  ;;  %v1124_v4 = vsel %vm1116_vm4, %v1806_v14, 8  ;;  %v1126_v5 = vsel %vm1118_vm5, %v1806_v14, 8  ;;  %v1099_v8 = vmax.f32 %v1097_v55, %v1098_v61 }
 0x2e6   : > { %v1132_v6 = vsel %vm1049_vm1, %v1124_v4, 2147483647  ;;  %v1152_v7 = vsel %vm1049_vm1, %v1126_v5, 2147483647  ;;  %v1091_v9 = vrot.slane %v1090_v62, 1  ;;  %v1163_v12 = vrot.slane %v1162_v3, 4 }
 0x2e7   : > { %vm1144_vm6 = vcmp.lt.s32.totalorder %v1142_v63, %v1143_v2  ;;  %v1133_v10 = vrot.slane %v1132_v6, 4  ;;  %v1153_v11 = vrot.slane %v1152_v7, 4  ;;  %vm1121_vm7 = vcmp.eq.f32.partialorder %v1845_v30, %v1099_v8 }
 0x2e8   : > { %v1092_v13 = vmax.f32 %v1090_v62, %v1091_v9  ;;  %v1108_v15 = vrot.slane %v1107_v1, 4  ;;  %v1145_v17 = vsel %vm1144_vm6, %v1142_v63, %v1143_v2  ;;  %v1129_v19 = vsel %vm1121_vm7, %v1806_v14, 8 }
 0x2e9   : > { %vm1134_vm8 = vcmp.lt.s32.totalorder %v1132_v6, %v1133_v10  ;;  %vm1154_vm9 = vcmp.lt.s32.totalorder %v1152_v7, %v1153_v11  ;;  %vm1164_vm11 = vcmp.lt.s32.totalorder %v1162_v3, %v1163_v12  ;;  %v1182_v23 = vsel %vm1049_vm1, %v1129_v19, 2147483647 }
 0x2ea   : > { %v1135_v18 = vsel %vm1134_vm8, %v1132_v6, %v1133_v10  ;;  %vm1120_vm10 = vcmp.eq.f32.partialorder %v1852_v36, %v1092_v13  ;;  %v1155_v22 = vsel %vm1154_vm9, %v1152_v7, %v1153_v11  ;;  %v1146_v25 = vrot.slane %v1145_v17, 2 }
 0x2eb   : > { %v1136_v21 = vrot.slane %v1135_v18, 2  ;;  %v1128_v24 = vsel %vm1120_vm10, %v1806_v14, 8  ;;  %v1109_v26 = vmax.f32 %v1107_v1, %v1108_v15  ;;  %v1156_v27 = vrot.slane %v1155_v22, 2 }
 0x2ec   : > { %v1172_v28 = vsel %vm1049_vm1, %v1128_v24, 2147483647  ;;  %v1165_v29 = vsel %vm1164_vm11, %v1162_v3, %v1163_v12  ;;  %v1183_v30 = vrot.slane %v1182_v23, 4  ;;  %vm1147_vm13 = vcmp.lt.s32.totalorder %v1145_v17, %v1146_v25 }
 0x2ed   : > { %vm1137_vm12 = vcmp.lt.s32.totalorder %v1135_v18, %v1136_v21  ;;  %v1173_v32 = vrot.slane %v1172_v28, 4  ;;  %v1110_v33 = vrot.slane %v1109_v26, 2  ;;  %v1166_v34 = vrot.slane %v1165_v29, 2 }
 0x2ee   : > { %v1138_v35 = vsel %vm1137_vm12, %v1135_v18, %v1136_v21  ;;  %vm1157_vm14 = vcmp.lt.s32.totalorder %v1155_v22, %v1156_v27  ;;  %vm1184_vm0 = vcmp.lt.s32.totalorder %v1182_v23, %v1183_v30  ;;  %v1102_v37 = vmax.f32 %v1100_v16, %v1101_v31 }
 0x2ef   : > { %vm1174_vm15 = vcmp.lt.s32.totalorder %v1172_v28, %v1173_v32  ;;  %v1111_v0 = vmax.f32 %v1109_v26, %v1110_v33  ;;  %v1148_v38 = vsel %vm1147_vm13, %v1145_v17, %v1146_v25  ;;  %v1139_v20 = vrot.slane %v1138_v35, 1 }
 0x2f0   : > { %v1175_v36 = vsel %vm1174_vm15, %v1172_v28, %v1173_v32  ;;  %v1158_v40 = vsel %vm1157_vm14, %v1155_v22, %v1156_v27  ;;  %v1103_v43 = vrot.slane %v1102_v37, 2  ;;  %v1185_v44 = vsel %vm1184_vm0, %v1182_v23, %v1183_v30 }
 0x2f1   : > { %v1176_v39 = vrot.slane %v1175_v36, 2  ;;  %v1112_v42 = vrot.slane %v1111_v0, 1  ;;  %v1149_v45 = vrot.slane %v1148_v38, 1  ;;  %vm1167_vm2 = vcmp.lt.s32.totalorder %v1165_v29, %v1166_v34 }
 0x2f2   : > { %v1104_v47 = vmax.f32 %v1102_v37, %v1103_v43  ;;  %v1159_v49 = vrot.slane %v1158_v40, 1  ;;  %vm1140_vm4 = vcmp.lt.s32.totalorder %v1138_v35, %v1139_v20  ;;  %v1186_v50 = vrot.slane %v1185_v44, 2 }
 0x2f3   : > { %v1113_v46 = vmax.f32 %v1111_v0, %v1112_v42  ;;  %vm1177_vm3 = vcmp.lt.s32.totalorder %v1175_v36, %v1176_v39  ;;  %v1168_v52 = vsel %vm1167_vm2, %v1165_v29, %v1166_v34  ;;  %vm1150_vm6 = vcmp.lt.s32.totalorder %v1148_v38, %v1149_v45 }
 0x2f4   : > { %v1105_v51 = vrot.slane %v1104_v47, 1  ;;  %v1178_v54 = vsel %vm1177_vm3, %v1175_v36, %v1176_v39  ;;  %v1141_v57 = vsel %vm1140_vm4, %v1138_v35, %v1139_v20  ;;  %vm1212_vm7 = vcmask 1041409  }
 0x2f5   : > { %vm1123_vm5 = vcmp.eq.f32.partialorder %v1859_v41, %v1113_v46  ;;  %vm1160_vm8 = vcmp.lt.s32.totalorder %v1158_v40, %v1159_v49  ;;  %v1169_v59 = vrot.slane %v1168_v52, 1  ;;  %vm1214_vm9 = vcmask 1042434  }
 0x2f6   : > { %v1131_v53 = vsel %vm1123_vm5, %v1806_v14, 8  ;;  %v1106_v56 = vmax.f32 %v1104_v47, %v1105_v51  ;;  %vm1187_vm10 = vcmp.lt.s32.totalorder %v1185_v44, %v1186_v50  ;;  %v1151_v60 = vsel %vm1150_vm6, %v1148_v38, %v1149_v45 }
 0x2f7   : > { %v1202_v55 = vsel %vm1049_vm1, %v1131_v53, 2147483647  ;;  %v1179_v41 = vrot.slane %v1178_v54, 1  ;;  %v1213_v62 = vsel %vm1212_vm7, %v1151_v60, %v1141_v57  ;;  %v1161_v63 = vsel %vm1160_vm8, %v1158_v40, %v1159_v49 }
 0x2f8   : > { %v1203_v58 = vrot.slane %v1202_v55, 4  ;;  %vm1122_vm11 = vcmp.eq.f32.partialorder %v1864_v48, %v1106_v56  ;;  %v1188_v3 = vsel %vm1187_vm10, %v1185_v44, %v1186_v50  ;;  %vm1170_vm13 = vcmp.lt.s32.totalorder %v1168_v52, %v1169_v59 }
 0x2f9   : > { %v1130_v61 = vsel %vm1122_vm11, %v1806_v14, 8  ;;  %vm1216_vm14 = vcmask 1043459   ;;  %v1215_v6 = vsel %vm1214_vm9, %v1161_v63, %v1213_v62  ;;  %vm1180_vm15 = vcmp.lt.s32.totalorder %v1178_v54, %v1179_v41 }
 0x2fa   : > { %vm1204_vm12 = vcmp.lt.s32.totalorder %v1202_v55, %v1203_v58  ;;  %v1192_v2 = vsel %vm1049_vm1, %v1130_v61, 2147483647  ;;  %v1189_v48 = vrot.slane %v1188_v3, 1  ;;  %v1171_v14 = vsel %vm1170_vm13, %v1168_v52, %v1169_v59 }
 0x2fb   : > { %v1205_v1 = vsel %vm1204_vm12, %v1202_v55, %v1203_v58  ;;  %v1193_v5 = vrot.slane %v1192_v2, 4  ;;  %v1181_v10 = vsel %vm1180_vm15, %v1178_v54, %v1179_v41  ;;  %v1217_v11 = vsel %vm1216_vm14, %v1171_v14, %v1215_v6 }
 0x2fc   : > { %v1206_v4 = vrot.slane %v1205_v1, 2  ;;  %vm1218_vm3 = vcmask 1044484   ;;  %vm1190_vm5 = vcmp.lt.s32.totalorder %v1188_v3, %v1189_v48  ;;  %vm1220_vm6 = vcmask 1045509  }
 0x2fd   : > { %vm1194_vm2 = vcmp.lt.s32.totalorder %v1192_v2, %v1193_v5  ;;  %v1219_v15 = vsel %vm1218_vm3, %v1181_v10, %v1217_v11  ;;  %vm1222_vm8 = vcmask 1046534   ;;  %v1191_v18 = vsel %vm1190_vm5, %v1188_v3, %v1189_v48 }
 0x2fe   : > { %vm1207_vm0 = vcmp.lt.s32.totalorder %v1205_v1, %v1206_v4  ;;  %v1195_v8 = vsel %vm1194_vm2, %v1192_v2, %v1193_v5  ;;  %vm1224_vm10 = vcmask 1047559   ;;  %v1221_v21 = vsel %vm1220_vm6, %v1191_v18, %v1219_v15 }
 0x2ff   : > { %v1208_v7 = vsel %vm1207_vm0, %v1205_v1, %v1206_v4  ;;  %v1196_v9 = vrot.slane %v1195_v8, 2 }
 0x300   : > { %v1209_v12 = vrot.slane %v1208_v7, 1 }
 0x301   : > { %vm1197_vm4 = vcmp.lt.s32.totalorder %v1195_v8, %v1196_v9 }
 0x302   : > { %v1198_v13 = vsel %vm1197_vm4, %v1195_v8, %v1196_v9  ;;  %vm1210_vm7 = vcmp.lt.s32.totalorder %v1208_v7, %v1209_v12 }
 0x303   : > { %v1199_v17 = vrot.slane %v1198_v13, 1  ;;  %v1211_v22 = vsel %vm1210_vm7, %v1208_v7, %v1209_v12 }
 0x305   : > { %vm1200_vm9 = vcmp.lt.s32.totalorder %v1198_v13, %v1199_v17 }
 0x306   : > { %v1201_v19 = vsel %vm1200_vm9, %v1198_v13, %v1199_v17 }
 0x307   : > { %v1223_v23 = vsel %vm1222_vm8, %v1201_v19, %v1221_v21 }
 0x308   : > { %v1225_v24 = vsel %vm1224_vm10, %v1211_v22, %v1223_v23 }
 0x309   : > { %1226 = vst.msk [vmem:[%s276_s8] sm:$0xff] %vm1049_vm1, %v1225_v24 }
 0x30a   : > { %1574 = shalt.err (!%p1571_p13)
}
 0x30b   : > { %s1575_s10 = scalar_lea.hbm %s1900_s23, 128  ;;  %s1579_s13 = scalar_lea.hbm %s1943_s5, 256 }
 0x30c   : > { %p1576_p5 = scmp.ne.s32.totalorder %s1900_s23, %s1575_s10  ;;  %p1580_p8 = scmp.lt.s32.totalorder %s1900_s23, %s1943_s5 }
 0x30d   : > { %p1581_p7 = scmp.lt.s32.totalorder %s1579_s13, %s1575_s10 }
 0x30e   : > { %p1577_p10 = pnand %p1576_p5, %p1959_p1 }
 0x30f   : > { %p1582_p11 = por %p1581_p7, %p1580_p8 }
 0x310   : > { %p1578_p4 = pneg %p1577_p10 }
 0x312   : > { %p1583_p0 = pnand %p1582_p11, %p1578_p4 }
 0x314   : > { %1586 = shalt.err (!%p1583_p0)
}
 0x315   : > { %1418 = dma.vmem_to_hbm [thread:$0]  (%p1959_p1), %s1250_s29, 128, %s1900_s23, %s1233_s22  }
 0x316 PF: > { %s1269_s7 = sand.u32 1, %s1617_s18   ;;  %p1960_p2 = scmp.ne.s32.totalorder %s1949_s25, 0 }
 0x317   : > { %p1961_p6 = scmp.ge.s32.totalorder %s1629_s21, 2  ;;  %s1270_s8 = scalar_lea.sflag [#allocation4], %s1269_s7 }
 0x319   : > { %p1432_p12 = pnand %p1961_p6, %p1960_p2 }
 0x31b   : > { %p1433_p3 = pneg %p1432_p12 }
 0x31d   : > { %1612 = dma.done.wait (%p1433_p3), %s1270_s8, 128  }
 0x31e   : > { %1614 = vsyncadd (%p1433_p3), %s1270_s8, 4294967168  ;;  %p20_p9 = scmp.ge.s32.totalorder %s1743_s17, 4   ;;  %s1962_s18 = smov %s1621_s19 }
 0x31f   : > { %s1963_s19 = smov %s1625_s20  ;;  %s1964_s20 = smov %s1752_s28 }
 0x320   : > { %s1965_s21 = smov %s1743_s17  ;;  %22 = sbr.rel (!%p20_p9) target bundleno = 6 (0x6), region = 101 }
 0x325   :  { %1275 = vsyncpa [#allocation3], 1 }
 0x326   :  { %1277 = vsyncpa [#allocation3 + $0x1], 1 }
 0x327   :  { %1278 = vsyncpa [#allocation6], 1 }
 0x328   :  { %1279 = vsyncpa [#allocation4], 1 }
 0x329   :  { %1281 = vsyncpa [#allocation4 + $0x1], 1 }

</bundles_post_ra>
